<compile_context>
chip_gen: v5e
topology: v5e:2x2
jax: 0.10.0
libtpu: 0.0.40
codegen_flags: <defaults>
</compile_context>

<pallas_src>
import functools

import jax
import jax.numpy as jnp
from jax.experimental import pallas as pl
from jax.experimental.pallas import tpu as pltpu

_LANE = 128
_SUB = 8
# 4096 rows/step * 128 lanes = 524288 batch elements / grid step.
_DEFAULT_MAX_ROWS_PER_STEP = 4096


def _round_up(n, m):
    return ((n + m - 1) // m) * m


def _cdiv(a, b):
    return -(-a // b)


def _choose_tiling(batch, max_rows_per_step):
    """Tiling over rows of 128 batch elements: returns (rows_per_step, num_steps)."""
    rows = _cdiv(batch, _LANE)
    n_steps = _cdiv(rows, max_rows_per_step)
    # v7x megacore: ensure >= 2 grid steps so both TensorCores get work, as
    # long as every step still holds a full (8, 128) tile.
    if n_steps == 1 and rows >= 2 * _SUB:
        n_steps = 2
    rows_per_step = _round_up(_cdiv(rows, n_steps), _SUB)
    return rows_per_step, n_steps


def _logistic_kernel(x_ref, p_ref, o_ref):
    # p_ref (SMEM): [w0, w1, b] as f32 scalars.
    w0 = p_ref[0]
    w1 = p_ref[1]
    b = p_ref[2]
    x0 = x_ref[0]                      # (Ts, 128) f32, fully dense tile
    x1 = x_ref[1]                      # (Ts, 128) f32, fully dense tile
    z = x0 * w0 + x1 * w1 + b          # pure VPU multiply-adds; no MXU for K=2
    # sigmoid(z) == 0.5 * tanh(0.5 * z) + 0.5 : one EUP op + two VALU ops.
    o_ref[...] = 0.5 * jnp.tanh(0.5 * z) + 0.5


@functools.partial(jax.jit, static_argnames=("max_rows_per_step",))
def logistic_forward_pallas(x, weight, bias, *,
                            max_rows_per_step=_DEFAULT_MAX_ROWS_PER_STEP):
    """x: (B, 2); weight: (1, 2) torch nn.Linear layout; bias: (1,). Returns (B, 1)."""
    B, F = x.shape
    assert F == 2, "LogisticModel expects 2 input features"

    ts, n_steps = _choose_tiling(B, max_rows_per_step)
    rp = ts * n_steps            # padded number of 128-wide rows
    bp = rp * _LANE              # padded batch

    # Single relayout pass (fused under jit): f32 cast + transpose + pad.
    xT = jnp.pad(x.astype(jnp.float32).T, ((0, 0), (0, bp - B)))   # (2, bp)
    x3 = xT.reshape(2, rp, _LANE)                                  # free row-major view

    # [w0, w1, b] packed for SMEM scalar reads.
    params = jnp.concatenate(
        [weight.reshape(-1), bias.reshape(-1)]).astype(jnp.float32)  # (3,)

    y = pl.pallas_call(
        _logistic_kernel,
        out_shape=jax.ShapeDtypeStruct((rp, _LANE), jnp.float32),
        grid=(n_steps,),
        in_specs=[
            pl.BlockSpec((2, ts, _LANE), lambda i: (0, i, 0)),       # dense VMEM tile
            pl.BlockSpec(memory_space=pltpu.MemorySpace.SMEM),       # 3 scalars in SMEM
        ],
        out_specs=pl.BlockSpec((ts, _LANE), lambda i: (i, 0)),       # lane-dense stores
        compiler_params=pltpu.CompilerParams(
            dimension_semantics=("parallel",),    # shard batch across v7x's 2 TCs
        ),
    )(x3, params)

    # Free reshape; the [:B] slice only copies when padding was needed.
    return y.reshape(-1)[:B].reshape(B, 1)


def logistic_forward(x, weight, bias, *, pallas_min_batch=16384):
    """Dispatcher: below ~16K batch the single fused XLA op sigmoid(x@W.T+b)
    wins over kernel launch + relayout overhead for <100 FLOPs of work."""
    if x.shape[0] < pallas_min_batch:
        return jax.nn.sigmoid(x @ weight.T + bias)
    return logistic_forward_pallas(x, weight, bias)


if __name__ == "__main__":
    key = jax.random.PRNGKey(0)
    kx, kw, kb, kx2 = jax.random.split(key, 4)

    # Deterministic parameter init mimicking nn.Linear(2, 1):
    # uniform(-1/sqrt(in_features), 1/sqrt(in_features))
    bound = 1.0 / jnp.sqrt(2.0)
    weight = jax.random.uniform(kw, (1, 2), minval=-bound, maxval=bound,
                                dtype=jnp.float32)
    bias = jax.random.uniform(kb, (1,), minval=-bound, maxval=bound,
                              dtype=jnp.float32)

    # Small-shape test (B=8): single grid step, exercises padding to an (8,128) tile.
    B = 8
    x = jax.random.normal(kx, (B, 2), dtype=jnp.float32)
    y = logistic_forward_pallas(x, weight, bias)
    jax.block_until_ready(y)
    y_ref = jax.nn.sigmoid(x @ weight.T + bias)
    assert y.shape == (B, 1)
    assert jnp.allclose(y, y_ref, atol=1e-5), "mismatch vs reference (B=8)"

    # Multi-step grid test: non-multiple batch + tiny row tile so the grid takes
    # several steps (validates index_maps, padding and the parallel grid axis).
    B2 = 2100
    x2 = jax.random.normal(kx2, (B2, 2), dtype=jnp.float32)
    y2 = logistic_forward_pallas(x2, weight, bias, max_rows_per_step=8)
    jax.block_until_ready(y2)
    y2_ref = jax.nn.sigmoid(x2 @ weight.T + bias)
    assert y2.shape == (B2, 1)
    assert jnp.allclose(y2, y2_ref, atol=1e-5), "mismatch vs reference (B=2100)"

    print("KERNEL_OK")
</pallas_src>

<mosaic_0001>
module attributes {stable_mosaic.version = 11 : i64} {
  func.func @_logistic_kernel(%arg0: i32, %arg1: memref<2x8x128xf32, #tpu.memory_space<vmem>>, %arg2: memref<3xf32, #tpu.memory_space<smem>>, %arg3: memref<8x128xf32, #tpu.memory_space<vmem>>) attributes {dimension_semantics = [#tpu.dimension_semantics<parallel>], iteration_bounds = array<i64: 1>, scalar_prefetch = 0 : i64, scratch_operands = 0 : i64, tpu.core_type = #tpu.core_type<tc>, window_params = [{transform_indices = @transform_0, window_bounds = array<i64: 2, 8, 128>}, {transform_indices = @transform_1, window_bounds = array<i64: 3>}, {transform_indices = @transform_2, window_bounds = array<i64: 8, 128>}]} {
    %c0 = arith.constant 0 : index
    %0 = memref.load %arg2[%c0] : memref<3xf32, #tpu.memory_space<smem>>
    %c1 = arith.constant 1 : index
    %1 = memref.load %arg2[%c1] : memref<3xf32, #tpu.memory_space<smem>>
    %c2 = arith.constant 2 : index
    %2 = memref.load %arg2[%c2] : memref<3xf32, #tpu.memory_space<smem>>
    %c0_0 = arith.constant 0 : index
    %c0_1 = arith.constant 0 : index
    %c0_2 = arith.constant 0 : index
    %3 = vector.load %arg1[%c0_0, %c0_1, %c0_2] : memref<2x8x128xf32, #tpu.memory_space<vmem>>, vector<1x8x128xf32>
    %4 = vector.shape_cast %3 : vector<1x8x128xf32> to vector<8x128xf32>
    %c1_3 = arith.constant 1 : index
    %c0_4 = arith.constant 0 : index
    %c0_5 = arith.constant 0 : index
    %5 = vector.load %arg1[%c1_3, %c0_4, %c0_5] : memref<2x8x128xf32, #tpu.memory_space<vmem>>, vector<1x8x128xf32>
    %6 = vector.shape_cast %5 : vector<1x8x128xf32> to vector<8x128xf32>
    %7 = vector.broadcast %0 : f32 to vector<8x128xf32>
    %8 = arith.mulf %4, %7 : vector<8x128xf32>
    %9 = vector.broadcast %1 : f32 to vector<8x128xf32>
    %10 = arith.mulf %6, %9 : vector<8x128xf32>
    %11 = arith.addf %8, %10 : vector<8x128xf32>
    %12 = vector.broadcast %2 : f32 to vector<8x128xf32>
    %13 = arith.addf %11, %12 : vector<8x128xf32>
    %cst = arith.constant 5.000000e-01 : f32
    %14 = vector.broadcast %cst : f32 to vector<8x128xf32>
    %15 = arith.mulf %14, %13 : vector<8x128xf32>
    %16 = math.tanh %15 : vector<8x128xf32>
    %cst_6 = arith.constant 5.000000e-01 : f32
    %17 = vector.broadcast %cst_6 : f32 to vector<8x128xf32>
    %18 = arith.mulf %17, %16 : vector<8x128xf32>
    %cst_7 = arith.constant 5.000000e-01 : f32
    %19 = vector.broadcast %cst_7 : f32 to vector<8x128xf32>
    %20 = arith.addf %18, %19 : vector<8x128xf32>
    %c0_8 = arith.constant 0 : index
    %c0_9 = arith.constant 0 : index
    %21 = vector.load %arg3[%c0_8, %c0_9] : memref<8x128xf32, #tpu.memory_space<vmem>>, vector<8x128xf32>
    tpu.vector_store %arg3[%c0_8, %c0_9], %20 {strides = array<i32>} : memref<8x128xf32, #tpu.memory_space<vmem>>, vector<8x128xf32>,
    return
  }
  func.func @transform_0(%arg0: i32) -> (i32, i32, i32) {
    %c0_i32 = arith.constant 0 : i32
    %c0_i32_0 = arith.constant 0 : i32
    %c0_i32_1 = arith.constant 0 : i32
    return %c0_i32, %arg0, %c0_i32_0 : i32, i32, i32
  }
  func.func @transform_1(%arg0: i32) -> i32 {
    %c0_i32 = arith.constant 0 : i32
    %c0_i32_0 = arith.constant 0 : i32
    return %c0_i32 : i32
  }
  func.func @transform_2(%arg0: i32) -> (i32, i32) {
    %c0_i32 = arith.constant 0 : i32
    %c0_i32_0 = arith.constant 0 : i32
    return %arg0, %c0_i32 : i32, i32
  }
}

</mosaic_0001>

<bundles_post_ra>
// kernel: logistic_forward_pallas.1
= control target key start
LH: loop header
LB: loop body
LE: loop exit
PB: predicated region body
PF: predicated region fallthrough
CT: control target
= control target key end

     0   :  { %7 = vsyncpa [#allocation3], 0  ;;  %s67_s12 = smov [#allocation2]   ;;  %s95_s0 = inlined_call_operand.vmem [shape: f32[2,8,128], index: 0, kind: input, shape index: {}]   ;;  %s96_s1 = inlined_call_operand.vmem [shape: f32[3], index: 1, kind: input, shape index: {}]   ;;  %s97_s2 = inlined_call_operand.vmem [shape: f32[8,128], index: 2, kind: output, shape index: {}]  }
   0x1   :  { %s15_s11 = sshll.u32 %s96_s1, 4  ;;  %s16_s11 = int_to_ptr.vmem [resolvable:$true] %s15_s11 }
   0x2   :  { %18 = dma.vmem_to_smem %s16_s11, 16, %s67_s12, [#allocation3]  }
   0x3   :  { %65 = dma.done.wait [#allocation3], 16  }
   0x4   :  { %66 = vsyncadd [#allocation3], 4294967280 }
   0x5   :  { %23 = sfence }
   0x6   :  { %s24_s13 = sld [smem:[#allocation2]]  ;;  %v27_v0 = vld [vmem:[%s95_s0] sm:$0xff]  ;;  %v49_v1 = vld [vmem:[%s95_s0 + $0x8] sm:$0xff] }
   0x7   :  { %s47_s14 = sld [smem:[#allocation2 + $0x1]] }
   0x8   :  { %s48_s15 = sld [smem:[#allocation2 + $0x2]] }
   0xc   :  { %v30_v2 = vstv %s24_s13 }
   0xd   :  { %v31_v3 = vmul.f32 %v30_v2, %v27_v0  ;;  %v32_v4 = vstv %s47_s14 }
   0xe   :  { %v33_v5 = vmul.f32 %v49_v1, %v32_v4  ;;  %v35_v6 = vstv %s48_s15 }
  0x10   :  { %v34_v7 = vadd.f32 %v33_v5, %v31_v3 }
  0x12   :  { %v36_v8 = vadd.f32 %v35_v6, %v34_v7 }
  0x14   :  { %v37_v9 = vmul.f32 0.5, %v36_v8 }
  0x16   :  { %51 = vtanh.f32 %v37_v9 }
  0x1c   :  { %v52_v10 = vpop.eup %51 }
  0x1d   :  { %v39_v11 = vmul.f32 0.5, %v52_v10 }
  0x1f   :  { %v40_v12 = vadd.f32 0.5, %v39_v11 }
  0x21   :  { %41 = vst [vmem:[%s97_s2] sm:$0xff] %v40_v12 }
  0x22   :  { %46 = vsyncpa [#allocation3], 1 }

</bundles_post_ra>
